<compile_context>
chip_gen: v5e
topology: v5e:2x2
jax: 0.10.0
libtpu: 0.0.40
codegen_flags: <defaults>
</compile_context>

<pallas_src>
import functools
import math

import jax
import jax.numpy as jnp
from jax.experimental import pallas as pl
from jax.experimental.pallas import tpu as pltpu


def _self_attention_kernel(xq_ref, xk_ref, xv_ref,
                           wq_ref, wk_ref, wv_ref,
                           out_ref, attn_ref,
                           *, b_local, seq, inv_scale):
    # Inputs: (b_local*seq, H) slabs; weights already transposed to (H, A).
    xq = xq_ref[...]
    xk = xk_ref[...]
    xv = xv_ref[...]
    wq = wq_ref[...]
    wk = wk_ref[...]
    wv = wv_ref[...]

    a_dim = wq.shape[1]

    # Linear projections on the MXU: plain 2-D matmuls, no transposes.
    # 1/scale is folded into q (cheaper than scaling the (S, S) scores).
    q = jnp.dot(xq, wq, preferred_element_type=jnp.float32) * inv_scale  # (R, A)
    k = jnp.dot(xk, wk, preferred_element_type=jnp.float32)              # (R, A)
    v = jnp.dot(xv, wv, preferred_element_type=jnp.float32)              # (R, A)

    q3 = q.reshape(b_local, seq, a_dim)
    k3 = k.reshape(b_local, seq, a_dim)
    v3 = v.reshape(b_local, seq, a_dim)

    # Scaled dot-product scores: batched contraction over A — no k.T needed.
    scores = jnp.einsum("bqa,bka->bqk", q3, k3,
                        preferred_element_type=jnp.float32)              # (b, S, S)

    # Numerically stable softmax over the last dim (exact reciprocal to keep
    # 1e-5 agreement with the f32 reference; approx=True only pays off at
    # large S).
    m = jnp.max(scores, axis=-1, keepdims=True)
    e = jnp.exp(scores - m)
    denom = jnp.sum(e, axis=-1, keepdims=True)
    attn = e * pl.reciprocal(denom, approx=False)                        # (b, S, S)

    # TODO(synk): dropout omitted (eval-mode identity); training dropout would
    # use pltpu.prng_seed + pltpu.prng_random_bits.
    # TODO(synk): optional `mask` argument of the reference forward not implemented.
    weighted = jnp.einsum("bqk,bka->bqa", attn, v3,
                          preferred_element_type=jnp.float32)            # (b, S, A)

    out_ref[...] = weighted.reshape(b_local * seq, a_dim).astype(out_ref.dtype)
    attn_ref[...] = attn.reshape(b_local * seq, seq).astype(attn_ref.dtype)


def _default_num_chunks(batch):
    # v5e/v6e have a single TensorCore: extra grid steps are pure per-step
    # overhead, so collapse fully. v7x has 2 TCs: keep a 2-way "parallel" axis.
    try:
        kind = jax.devices()[0].device_kind.lower()
    except Exception:
        return 1
    if "v7" in kind and batch % 2 == 0:
        return 2
    return 1


def self_attention(query, key, value, wq, wk, wv, *, num_chunks=None):
    """query/key/value: (B, S, H) float32; wq/wk/wv: (A, H) float32 (PyTorch layout).
    Returns (weighted_v: (B, S, A), attention_score: (B, S, S))."""
    B, S, H = query.shape
    A = wq.shape[0]
    inv_scale = 1.0 / math.sqrt(float(A))

    if num_chunks is None:
        num_chunks = _default_num_chunks(B)
    if B % num_chunks != 0:
        num_chunks = 1
    b_local = B // num_chunks
    rows = b_local * S

    # Free layout plumbing in the wrapper: 2-D input/output slabs and
    # pre-transposed (H, A) weights so the kernel has zero in-kernel transposes.
    xq2 = query.reshape(B * S, H)
    xk2 = key.reshape(B * S, H)
    xv2 = value.reshape(B * S, H)
    wq_t = wq.T
    wk_t = wk.T
    wv_t = wv.T

    kernel = functools.partial(_self_attention_kernel,
                               b_local=b_local, seq=S, inv_scale=inv_scale)

    x_spec = pl.BlockSpec((rows, H), lambda c: (c, 0))
    w_spec = pl.BlockSpec((H, A), lambda c: (0, 0))

    out2, attn2 = pl.pallas_call(
        kernel,
        out_shape=(
            jax.ShapeDtypeStruct((B * S, A), query.dtype),
            jax.ShapeDtypeStruct((B * S, S), query.dtype),
        ),
        grid_spec=pltpu.PrefetchScalarGridSpec(
            num_scalar_prefetch=0,
            grid=(num_chunks,),
            in_specs=[x_spec, x_spec, x_spec, w_spec, w_spec, w_spec],
            out_specs=[
                pl.BlockSpec((rows, A), lambda c: (c, 0)),
                pl.BlockSpec((rows, S), lambda c: (c, 0)),
            ],
        ),
        compiler_params=pltpu.CompilerParams(
            dimension_semantics=("parallel",)),
    )(xq2, xk2, xv2, wq_t, wk_t, wv_t)

    return out2.reshape(B, S, A), attn2.reshape(B, S, S)


def _reference(query, key, value, wq, wk, wv):
    q = query @ wq.T
    k = key @ wk.T
    v = value @ wv.T
    scores = jnp.einsum("bqa,bka->bqk", q, k) / jnp.sqrt(jnp.float32(wq.shape[0]))
    attn = jax.nn.softmax(scores, axis=-1)
    out = jnp.einsum("bqk,bka->bqa", attn, v)
    return out, attn


if __name__ == "__main__":
    # Module params: hidden_dim=32, n_head=4 -> attention_dim=8, dropout in eval mode.
    B, S, H, N_HEAD = 2, 8, 32, 4
    A = H // N_HEAD

    key0 = jax.random.PRNGKey(0)
    kq, kk, kv, kwq, kwk, kwv = jax.random.split(key0, 6)

    query = jax.random.normal(kq, (B, S, H), dtype=jnp.float32)
    key_in = jax.random.normal(kk, (B, S, H), dtype=jnp.float32)
    value = jax.random.normal(kv, (B, S, H), dtype=jnp.float32)

    # Deterministic "init_weight"-style initialization (uniform, PyTorch-like scale).
    bound = 1.0 / math.sqrt(H)
    wq = jax.random.uniform(kwq, (A, H), jnp.float32, -bound, bound)
    wk = jax.random.uniform(kwk, (A, H), jnp.float32, -bound, bound)
    wv = jax.random.uniform(kwv, (A, H), jnp.float32, -bound, bound)

    out, attn = self_attention(query, key_in, value, wq, wk, wv)
    jax.block_until_ready((out, attn))

    out_ref, attn_ref = _reference(query, key_in, value, wq, wk, wv)
    assert out.shape == (B, S, A) and attn.shape == (B, S, S)
    assert jnp.allclose(out, out_ref, atol=1e-5, rtol=1e-5)
    assert jnp.allclose(attn, attn_ref, atol=1e-5, rtol=1e-5)

    print("KERNEL_OK")
</pallas_src>

<mosaic_0001>
module attributes {stable_mosaic.version = 11 : i64} {
  func.func @_self_attention_kernel(%arg0: i32, %arg1: memref<16x32xf32, #tpu.memory_space<vmem>>, %arg2: memref<16x32xf32, #tpu.memory_space<vmem>>, %arg3: memref<16x32xf32, #tpu.memory_space<vmem>>, %arg4: memref<32x8xf32, #tpu.memory_space<vmem>>, %arg5: memref<32x8xf32, #tpu.memory_space<vmem>>, %arg6: memref<32x8xf32, #tpu.memory_space<vmem>>, %arg7: memref<16x8xf32, #tpu.memory_space<vmem>>, %arg8: memref<16x8xf32, #tpu.memory_space<vmem>>) attributes {dimension_semantics = [#tpu.dimension_semantics<parallel>], iteration_bounds = array<i64: 1>, scalar_prefetch = 0 : i64, scratch_operands = 0 : i64, tpu.core_type = #tpu.core_type<tc>, window_params = [{transform_indices = @transform_0, window_bounds = array<i64: 16, 32>}, {transform_indices = @transform_1, window_bounds = array<i64: 16, 32>}, {transform_indices = @transform_2, window_bounds = array<i64: 16, 32>}, {pipeline_mode = #tpu.pipeline_mode<synchronous>, transform_indices = @transform_3, window_bounds = array<i64: 32, 8>}, {pipeline_mode = #tpu.pipeline_mode<synchronous>, transform_indices = @transform_4, window_bounds = array<i64: 32, 8>}, {pipeline_mode = #tpu.pipeline_mode<synchronous>, transform_indices = @transform_5, window_bounds = array<i64: 32, 8>}, {transform_indices = @transform_6, window_bounds = array<i64: 16, 8>}, {transform_indices = @transform_7, window_bounds = array<i64: 16, 8>}]} {
    %c0 = arith.constant 0 : index
    %c0_0 = arith.constant 0 : index
    %0 = vector.load %arg1[%c0, %c0_0] : memref<16x32xf32, #tpu.memory_space<vmem>>, vector<16x32xf32>
    %c0_1 = arith.constant 0 : index
    %c0_2 = arith.constant 0 : index
    %1 = vector.load %arg2[%c0_1, %c0_2] : memref<16x32xf32, #tpu.memory_space<vmem>>, vector<16x32xf32>
    %c0_3 = arith.constant 0 : index
    %c0_4 = arith.constant 0 : index
    %2 = vector.load %arg3[%c0_3, %c0_4] : memref<16x32xf32, #tpu.memory_space<vmem>>, vector<16x32xf32>
    %c0_5 = arith.constant 0 : index
    %c0_6 = arith.constant 0 : index
    %3 = vector.load %arg4[%c0_5, %c0_6] : memref<32x8xf32, #tpu.memory_space<vmem>>, vector<32x8xf32>
    %c0_7 = arith.constant 0 : index
    %c0_8 = arith.constant 0 : index
    %4 = vector.load %arg5[%c0_7, %c0_8] : memref<32x8xf32, #tpu.memory_space<vmem>>, vector<32x8xf32>
    %c0_9 = arith.constant 0 : index
    %c0_10 = arith.constant 0 : index
    %5 = vector.load %arg6[%c0_9, %c0_10] : memref<32x8xf32, #tpu.memory_space<vmem>>, vector<32x8xf32>
    %cst = arith.constant dense<0.000000e+00> : vector<16x8xf32>
    %6 = tpu.matmul %0, %3, %cst {dimension_numbers = #tpu.dot_dimension_numbers<[1], [0], [0], [1], [0, 0, 1, 1], [], []>} : vector<16x32xf32>, vector<32x8xf32>, vector<16x8xf32> -> vector<16x8xf32>
    %cst_11 = arith.constant 0.353553385 : f32
    %7 = vector.broadcast %cst_11 : f32 to vector<16x8xf32>
    %8 = arith.mulf %6, %7 : vector<16x8xf32>
    %cst_12 = arith.constant dense<0.000000e+00> : vector<16x8xf32>
    %9 = tpu.matmul %1, %4, %cst_12 {dimension_numbers = #tpu.dot_dimension_numbers<[1], [0], [0], [1], [0, 0, 1, 1], [], []>} : vector<16x32xf32>, vector<32x8xf32>, vector<16x8xf32> -> vector<16x8xf32>
    %cst_13 = arith.constant dense<0.000000e+00> : vector<16x8xf32>
    %10 = tpu.matmul %2, %5, %cst_13 {dimension_numbers = #tpu.dot_dimension_numbers<[1], [0], [0], [1], [0, 0, 1, 1], [], []>} : vector<16x32xf32>, vector<32x8xf32>, vector<16x8xf32> -> vector<16x8xf32>
    %11 = vector.shape_cast %8 : vector<16x8xf32> to vector<2x8x8xf32>
    %12 = vector.shape_cast %9 : vector<16x8xf32> to vector<2x8x8xf32>
    %13 = vector.shape_cast %10 : vector<16x8xf32> to vector<2x8x8xf32>
    "tpu.trace_start"() <{level = 10 : i32, message = "bqa,bka->bqk"}> : () -> ()
    %cst_14 = arith.constant dense<0.000000e+00> : vector<2x8x8xf32>
    %14 = tpu.matmul %11, %12, %cst_14 {dimension_numbers = #tpu.dot_dimension_numbers<[2], [2], [1], [1], [0, 0, 0, 1, 1, 1], [0], [0]>} : vector<2x8x8xf32>, vector<2x8x8xf32>, vector<2x8x8xf32> -> vector<2x8x8xf32>
    "tpu.trace_stop"() : () -> ()
    %cst_15 = arith.constant dense<0xFF800000> : vector<2x8xf32>
    %15 = vector.multi_reduction <maximumf>, %14, %cst_15 [2] : vector<2x8x8xf32> to vector<2x8xf32>
    %16 = vector.shape_cast %15 : vector<2x8xf32> to vector<2x8x1xf32>
    %17 = vector.broadcast %16 : vector<2x8x1xf32> to vector<2x8x8xf32>
    %18 = arith.subf %14, %17 : vector<2x8x8xf32>
    %19 = math.exp %18 : vector<2x8x8xf32>
    %cst_16 = arith.constant dense<0.000000e+00> : vector<2x8xf32>
    %20 = vector.multi_reduction <add>, %19, %cst_16 [2] : vector<2x8x8xf32> to vector<2x8xf32>
    %21 = vector.shape_cast %20 : vector<2x8xf32> to vector<2x8x1xf32>
    %22 = tpu.reciprocal %21 : vector<2x8x1xf32> -> vector<2x8x1xf32>
    %23 = vector.broadcast %22 : vector<2x8x1xf32> to vector<2x8x8xf32>
    %24 = arith.mulf %19, %23 : vector<2x8x8xf32>
    "tpu.trace_start"() <{level = 10 : i32, message = "bqk,bka->bqa"}> : () -> ()
    %cst_17 = arith.constant dense<0.000000e+00> : vector<2x8x8xf32>
    %25 = tpu.matmul %24, %13, %cst_17 {dimension_numbers = #tpu.dot_dimension_numbers<[2], [1], [1], [2], [0, 0, 0, 1, 1, 2], [0], [0]>} : vector<2x8x8xf32>, vector<2x8x8xf32>, vector<2x8x8xf32> -> vector<2x8x8xf32>
    "tpu.trace_stop"() : () -> ()
    %26 = vector.shape_cast %25 : vector<2x8x8xf32> to vector<16x8xf32>
    %c0_18 = arith.constant 0 : index
    %c0_19 = arith.constant 0 : index
    %27 = vector.load %arg7[%c0_18, %c0_19] : memref<16x8xf32, #tpu.memory_space<vmem>>, vector<16x8xf32>
    tpu.vector_store %arg7[%c0_18, %c0_19], %26 {strides = array<i32>} : memref<16x8xf32, #tpu.memory_space<vmem>>, vector<16x8xf32>,
    %28 = vector.shape_cast %24 : vector<2x8x8xf32> to vector<16x8xf32>
    %c0_20 = arith.constant 0 : index
    %c0_21 = arith.constant 0 : index
    %29 = vector.load %arg8[%c0_20, %c0_21] : memref<16x8xf32, #tpu.memory_space<vmem>>, vector<16x8xf32>
    tpu.vector_store %arg8[%c0_20, %c0_21], %28 {strides = array<i32>} : memref<16x8xf32, #tpu.memory_space<vmem>>, vector<16x8xf32>,
    return
  }
  func.func @transform_0(%arg0: i32) -> (i32, i32) {
    %c0_i32 = arith.constant 0 : i32
    %c0_i32_0 = arith.constant 0 : i32
    return %arg0, %c0_i32 : i32, i32
  }
  func.func @transform_1(%arg0: i32) -> (i32, i32) {
    %c0_i32 = arith.constant 0 : i32
    %c0_i32_0 = arith.constant 0 : i32
    return %arg0, %c0_i32 : i32, i32
  }
  func.func @transform_2(%arg0: i32) -> (i32, i32) {
    %c0_i32 = arith.constant 0 : i32
    %c0_i32_0 = arith.constant 0 : i32
    return %arg0, %c0_i32 : i32, i32
  }
  func.func @transform_3(%arg0: i32) -> (i32, i32) {
    %c0_i32 = arith.constant 0 : i32
    %c0_i32_0 = arith.constant 0 : i32
    %c0_i32_1 = arith.constant 0 : i32
    return %c0_i32, %c0_i32_0 : i32, i32
  }
  func.func @transform_4(%arg0: i32) -> (i32, i32) {
    %c0_i32 = arith.constant 0 : i32
    %c0_i32_0 = arith.constant 0 : i32
    %c0_i32_1 = arith.constant 0 : i32
    return %c0_i32, %c0_i32_0 : i32, i32
  }
  func.func @transform_5(%arg0: i32) -> (i32, i32) {
    %c0_i32 = arith.constant 0 : i32
    %c0_i32_0 = arith.constant 0 : i32
    %c0_i32_1 = arith.constant 0 : i32
    return %c0_i32, %c0_i32_0 : i32, i32
  }
  func.func @transform_6(%arg0: i32) -> (i32, i32) {
    %c0_i32 = arith.constant 0 : i32
    %c0_i32_0 = arith.constant 0 : i32
    return %arg0, %c0_i32 : i32, i32
  }
  func.func @transform_7(%arg0: i32) -> (i32, i32) {
    %c0_i32 = arith.constant 0 : i32
    %c0_i32_0 = arith.constant 0 : i32
    return %arg0, %c0_i32 : i32, i32
  }
}

</mosaic_0001>

<bundles_post_ra>
// kernel: tpu_custom_call.1
= control target key start
LH: loop header
LB: loop body
LE: loop exit
PB: predicated region body
PF: predicated region fallthrough
CT: control target
= control target key end

     0   :  { %vm43_vm0 = vcmask 261120   ;;  %vm133_vm1 = vcmask 64512   ;;  %s438_s4 = inlined_call_operand.vmem [shape: f32[32,8], index: 4, kind: input, shape index: {}]   ;;  %s439_s3 = inlined_call_operand.vmem [shape: f32[32,8], index: 3, kind: input, shape index: {}]   ;;  %s440_s1 = inlined_call_operand.vmem [shape: f32[16,32], index: 1, kind: input, shape index: {}]   ;;  %s441_s0 = inlined_call_operand.vmem [shape: f32[16,32], index: 0, kind: input, shape index: {}]   ;;  %s442_s5 = inlined_call_operand.vmem [shape: f32[32,8], index: 5, kind: input, shape index: {}]   ;;  %s443_s2 = inlined_call_operand.vmem [shape: f32[16,32], index: 2, kind: input, shape index: {}]   ;;  %s444_s7 = inlined_call_operand.vmem [shape: f32[16,8], index: 7, kind: output, shape index: {1}]   ;;  %s445_s6 = inlined_call_operand.vmem [shape: f32[16,8], index: 6, kind: output, shape index: {0}]  }
   0x1   :  { %v38_v0 = vld [vmem:[%s438_s4 + $0x18] sm:$0xff]  ;;  %v37_v2 = vld [vmem:[%s438_s4 + $0x10] sm:$0xff]  ;;  %v36_v4 = vld [vmem:[%s438_s4 + $0x8] sm:$0xff] }
   0x2   :  { %v34_v1 = vld [vmem:[%s439_s3 + $0x18] sm:$0xff]  ;;  %93 = vmatpush.msra.mxu1 %v38_v0  ;;  %v33_v3 = vld [vmem:[%s439_s3 + $0x10] sm:$0xff]  ;;  %v32_v5 = vld [vmem:[%s439_s3 + $0x8] sm:$0xff] }
   0x3   :  { %62 = vmatpush.msra.mxu0 %v34_v1  ;;  %v35_v6 = vld [vmem:[%s438_s4] sm:$0xff]  ;;  %v28_v10 = vld [vmem:[%s440_s1 + $0x8] sm:$0xff]  ;;  %v42_v18 = vld [vmem:[%s442_s5 + $0x18] sm:$0xff] }
   0x4   :  { %94 = vmatpush.msra.mxu1 %v37_v2  ;;  %v31_v7 = vld [vmem:[%s439_s3] sm:$0xff]  ;;  %v26_v11 = vld [vmem:[%s441_s0 + $0x8] sm:$0xff]  ;;  %v41_v19 = vld [vmem:[%s442_s5 + $0x10] sm:$0xff]  ;;  %122 = vmatpush.msra.mxu2 %v42_v18 }
   0x5   :  { %63 = vmatpush.msra.mxu0 %v33_v3  ;;  %v27_v8 = vld [vmem:[%s440_s1] sm:$0xff]  ;;  %v40_v24 = vld [vmem:[%s442_s5 + $0x8] sm:$0xff] }
   0x6   :  { %95 = vmatpush.msra.mxu1 %v36_v4  ;;  %v25_v9 = vld [vmem:[%s441_s0] sm:$0xff]  ;;  %123 = vmatpush.msra.mxu2 %v41_v19  ;;  %v30_v27 = vld [vmem:[%s443_s2 + $0x8] sm:$0xff] }
   0x7   :  { %64 = vmatpush.msra.mxu0 %v32_v5  ;;  %v39_v25 = vld [vmem:[%s442_s5] sm:$0xff] }
   0x8   :  { %96 = vmatpush.msra.mxu1 %v35_v6  ;;  %124 = vmatpush.msra.mxu2 %v40_v24  ;;  %v29_v26 = vld [vmem:[%s443_s2] sm:$0xff] }
   0x9   :  { %65 = vmatpush.msra.mxu0 %v31_v7  ;;  %294 = vmatmul.msk.f32.vlgmr.msra.gmra.mxu1 %vm43_vm0, %v27_v8 }
   0xa   :  { %292 = vmatmul.msk.f32.vlgmr.msra.gmra.mxu0 %vm43_vm0, %v25_v9  ;;  %125 = vmatpush.msra.mxu2 %v39_v25 }
   0xb   :  { %296 = vmatmul.msk.f32.vlgmr.msra.gmra.mxu2 %vm43_vm0, %v29_v26 }
  0x11   :  { %295 = vmatmul.msk.f32.gmra.mxu1 %vm43_vm0, %v28_v10 }
  0x12   :  { %293 = vmatmul.msk.f32.gmra.mxu0 %vm43_vm0, %v26_v11 }
  0x13   :  { %297 = vmatmul.msk.f32.gmra.mxu2 %vm43_vm0, %v30_v27 }
  0x86   :  { %v98_v12 = vpop.f32.mrf.mxu1 }
  0x87   :  { %v67_v13 = vpop.f32.mrf.mxu0  ;;  %298 = vmatpush.xpose.msk.msra.mxu3 %vm133_vm1, %v98_v12 }
  0x88   :  { %v73_v14 = vmul.f32 0.35355338, %v67_v13 }
  0x8a   :  { %299 = vmatmul.msk.f32.vlgmr.msra.gmra.mxu3 %vm133_vm1, %v73_v14 }
  0x8e   :  { %v101_v15 = vpop.f32.mrf.mxu1  ;;  %v127_v38 = vpop.f32.mrf.mxu2 }
  0x8f   :  { %v70_v16 = vpop.f32.mrf.mxu0  ;;  %300 = vmatpush.xpose.msk.msrb.mxu3 %vm133_vm1, %v101_v15 }
  0x90   :  { %v74_v17 = vmul.f32 0.35355338, %v70_v16 }
  0x92   :  { %301 = vmatmul.msk.f32.vlgmr.msrb.gmra.mxu3 %vm133_vm1, %v74_v17 }
  0x93   :  { %252 = vmatpush.msra.mxu3 %v127_v38 }
  0x96   :  { %v130_v39 = vpop.f32.mrf.mxu2 }
  0x97   :  { %275 = vmatpush.msrb.mxu0 %v130_v39 }
 0x10d   :  { %v157_v20 = vpop.f32.mrf.mxu3 }
 0x10e   :  { %v186_v21 = vsel %vm133_vm1, %v157_v20, -inf }
 0x10f   :  { %187 = vmax.xlane.f32.xlu0 %v186_v21 }
 0x115   :  { %v183_v22 = vpop.f32.mrf.mxu3 }
 0x116   :  { %v189_v23 = vsel %vm133_vm1, %v183_v22, -inf }
 0x117   :  { %190 = vmax.xlane.f32.xlu0 %v189_v23 }
 0x182   :  { %v188_v28 = vpop.xlane.xlu0 %187 }
 0x183   :  { %v192_v29 = vsub.f32 %v157_v20, %v188_v28 }
 0x185   :  { %v194_v30 = vmul.f32 1.442695, %v192_v29 }
 0x187   :  { %304 = vpow2.f32 %v194_v30 }
 0x18a   :  { %v191_v31 = vpop.xlane.xlu0 %190 }
 0x18b   :  { %v193_v32 = vsub.f32 %v183_v22, %v191_v31 }
 0x18d   :  { %v305_v33 = vpop.eup %304  ;;  %v196_v34 = vmul.f32 1.442695, %v193_v32 }
 0x18e   :  { %v198_v35 = vsel %vm133_vm1, %v305_v33, 0.0 }
 0x18f   :  { %306 = vpow2.f32 %v196_v34  ;;  %199 = vadd.xlane.f32.xlu1 %v198_v35 }
 0x195   :  { %v307_v36 = vpop.eup %306 }
 0x196   :  { %v201_v37 = vsel %vm133_vm1, %v307_v36, 0.0 }
 0x197   :  { %202 = vadd.xlane.f32.xlu1 %v201_v37 }
 0x202   :  { %v200_v40 = vpop.xlane.xlu1 %199 }
 0x203   :  { %308 = vrcp.f32 %v200_v40  ;;  %v215_v45 = vand.u32 2147483648, %v200_v40  ;;  %v213_v47 = vand.u32 2147483647, %v200_v40  ;;  %vm209_vm3 = vweird.f32 %v200_v40 }
 0x205   :  { %v216_v50 = vor.u32 1.1754944e-38, %v215_v45  ;;  %vm214_vm5 = vcmp.eq.f32.partialorder %v213_v47, 8.507059e+37 }
 0x209   :  { %v309_v41 = vpop.eup %308 }
 0x20a   :  { %v205_v42 = vmul.f32 %v309_v41, %v200_v40  ;;  %v203_v43 = vpop.xlane.xlu1 %202  ;;  %vm210_vm2 = vweird.f32 %v309_v41 }
 0x20b   :  { %310 = vrcp.f32 %v203_v43  ;;  %vm211_vm4 = vmor %vm209_vm3, %vm210_vm2  ;;  %v229_v56 = vand.u32 2147483648, %v203_v43  ;;  %v227_v58 = vand.u32 2147483647, %v203_v43  ;;  %vm223_vm7 = vweird.f32 %v203_v43 }
 0x20c   :  { %v206_v44 = vsub.f32 1.0, %v205_v42 }
 0x20d   :  { %v230_v60 = vor.u32 1.1754944e-38, %v229_v56  ;;  %vm228_vm9 = vcmp.eq.f32.partialorder %v227_v58, 8.507059e+37 }
 0x20e   :  { %v207_v46 = vmul.f32 %v309_v41, %v206_v44 }
 0x210   :  { %v208_v48 = vadd.f32 %v309_v41, %v207_v46 }
 0x211   :  { %v311_v49 = vpop.eup %310 }
 0x212   :  { %v212_v51 = vsel %vm211_vm4, %v309_v41, %v208_v48  ;;  %v219_v52 = vmul.f32 %v311_v49, %v203_v43  ;;  %vm224_vm6 = vweird.f32 %v311_v49 }
 0x213   :  { %v217_v53 = vsel %vm214_vm5, %v216_v50, %v212_v51  ;;  %vm225_vm8 = vmor %vm223_vm7, %vm224_vm6 }
 0x214   :  { %v220_v54 = vsub.f32 1.0, %v219_v52  ;;  %v232_v55 = vmul.f32 %v305_v33, %v217_v53 }
 0x216   :  { %v221_v57 = vmul.f32 %v311_v49, %v220_v54  ;;  %302 = vmatmul.msk.f32.vlgmr.msra.gmra.mxu3 %vm133_vm1, %v232_v55  ;;  %282 = vst.msk [vmem:[%s444_s7] sm:$0xff] %vm133_vm1, %v232_v55 }
 0x218   :  { %v222_v59 = vadd.f32 %v311_v49, %v221_v57 }
 0x21a   :  { %v226_v61 = vsel %vm225_vm8, %v311_v49, %v222_v59 }
 0x21b   :  { %v231_v62 = vsel %vm228_vm9, %v230_v60, %v226_v61 }
 0x21c   :  { %v233_v63 = vmul.f32 %v307_v36, %v231_v62 }
 0x21e   :  { %303 = vmatmul.msk.f32.vlgmr.msrb.gmra.mxu0 %vm133_vm1, %v233_v63  ;;  %283 = vst.msk [vmem:[%s444_s7 + $0x8] sm:$0xff] %vm133_vm1, %v233_v63 }
 0x299   :  { %v254_v0 = vpop.f32.mrf.mxu3 }
 0x29a   :  { %280 = vst.msk [vmem:[%s445_s6] sm:$0xff] %vm133_vm1, %v254_v0 }
 0x29b   :  { %v277_v1 = vpop.f32.mrf.mxu0 }
 0x29c   :  { %281 = vst.msk [vmem:[%s445_s6 + $0x8] sm:$0xff] %vm133_vm1, %v277_v1 }

</bundles_post_ra>
